<compile_context>
chip_gen: v5e
topology: v5e:2x2
jax: 0.10.0
libtpu: 0.0.40
codegen_flags: <defaults>
</compile_context>

<pallas_src>
import jax
import jax.numpy as jnp
from jax import lax
from jax.experimental import pallas as pl
from jax.experimental.pallas import tpu as pltpu

LANES = 128
SUBLANES = 8
MAX_BLOCK_ROWS = 2048  # (2048, 128) f32 block = 1 MiB


def hint_loss(fs, ft):
    """MSE(fs, ft) with 'mean' reduction, matching nn.MSELoss()."""
    assert fs.shape == ft.shape, "HintLoss expects fs and ft of equal shape"
    n = fs.size

    flat_fs = fs.reshape(-1)
    flat_ft = ft.reshape(-1)

    # Aligned prefix (multiple of 8*128) goes through the kernel; the small
    # tail (< 1024 elements) is handled in plain JAX. No full-array pad/cast.
    chunk = SUBLANES * LANES
    n_main = (n // chunk) * chunk
    rows = n_main // LANES  # multiple of 8 (possibly 0)

    total = jnp.float32(0.0)

    if rows > 0:
        block_rows = min(MAX_BLOCK_ROWS, rows)          # multiple of 8
        num_blocks = (rows + block_rows - 1) // block_rows
        ncores = 2 if (num_blocks >= 2 and num_blocks % 2 == 0) else 1
        blocks_per_core = num_blocks // ncores
        needs_mask = (rows % block_rows) != 0           # only last block partial

        fs2d = flat_fs[:n_main].reshape(rows, LANES)
        ft2d = flat_ft[:n_main].reshape(rows, LANES)

        def kernel(fs_ref, ft_ref, out_ref, acc_ref):
            i = pl.program_id(1)

            @pl.when(i == 0)
            def _():
                acc_ref[...] = jnp.zeros_like(acc_ref)

            d = fs_ref[...].astype(jnp.float32) - ft_ref[...].astype(jnp.float32)
            sq = d * d
            if needs_mask:
                blk = pl.program_id(0) * blocks_per_core + i
                row_ids = blk * block_rows + lax.broadcasted_iota(
                    jnp.int32, (block_rows, LANES), 0)
                sq = jnp.where(row_ids < rows, sq, 0.0)
            acc_ref[...] += sq  # pure VPU accumulate, hidden under DMA

            @pl.when(i == pl.num_programs(1) - 1)
            def _():
                col = jnp.sum(acc_ref[...], axis=1, keepdims=True)   # (block_rows, 1)
                out_ref[...] = jnp.sum(col, axis=0, keepdims=True)   # (1, 1)

        partials = pl.pallas_call(
            kernel,
            out_shape=jax.ShapeDtypeStruct((ncores, 1), jnp.float32),
            grid_spec=pltpu.PrefetchScalarGridSpec(
                num_scalar_prefetch=0,
                grid=(ncores, blocks_per_core),
                in_specs=[
                    pl.BlockSpec((block_rows, LANES),
                                 lambda c, i: (c * blocks_per_core + i, 0)),
                    pl.BlockSpec((block_rows, LANES),
                                 lambda c, i: (c * blocks_per_core + i, 0)),
                ],
                out_specs=pl.BlockSpec((1, 1), lambda c, i: (c, 0)),
                scratch_shapes=[pltpu.VMEM((block_rows, LANES), jnp.float32)],
            ),
            compiler_params=pltpu.CompilerParams(
                dimension_semantics=("parallel", "arbitrary"),
            ),
        )(fs2d, ft2d)
        total = total + jnp.sum(partials)

    if n_main < n:  # tiny tail (< 1024 elements) in plain JAX
        dt = (flat_fs[n_main:].astype(jnp.float32)
              - flat_ft[n_main:].astype(jnp.float32))
        total = total + jnp.sum(dt * dt)

    return (total / jnp.float32(n)).astype(jnp.float32)


if __name__ == "__main__":
    key = jax.random.PRNGKey(0)

    # Main check: student / teacher feature maps, NCHW like PyTorch.
    k1, k2 = jax.random.split(key)
    fs = jax.random.normal(k1, (2, 4, 16, 16), dtype=jnp.float32)
    ft = jax.random.normal(k2, (2, 4, 16, 16), dtype=jnp.float32)
    loss = hint_loss(fs, ft)
    jax.block_until_ready(loss)
    ref = jnp.mean((fs - ft) ** 2)
    assert jnp.allclose(loss, ref, rtol=1e-5, atol=1e-6), (loss, ref)

    # Unaligned size: exercises the plain-JAX tail path.
    k3, k4 = jax.random.split(k2)
    fs2 = jax.random.normal(k3, (3, 5, 9, 11), dtype=jnp.float32)
    ft2 = jax.random.normal(k4, (3, 5, 9, 11), dtype=jnp.float32)
    loss2 = hint_loss(fs2, ft2)
    jax.block_until_ready(loss2)
    ref2 = jnp.mean((fs2 - ft2) ** 2)
    assert jnp.allclose(loss2, ref2, rtol=1e-5, atol=1e-6), (loss2, ref2)

    # Larger size: exercises big blocks, partial-block masking and the
    # two-partial ("parallel" core axis) output path.
    k5, k6 = jax.random.split(k4)
    fs3 = jax.random.normal(k5, (4, 16, 80, 80), dtype=jnp.float32)
    ft3 = jax.random.normal(k6, (4, 16, 80, 80), dtype=jnp.float32)
    loss3 = hint_loss(fs3, ft3)
    jax.block_until_ready(loss3)
    ref3 = jnp.mean((fs3 - ft3) ** 2)
    assert jnp.allclose(loss3, ref3, rtol=1e-5, atol=1e-6), (loss3, ref3)

    print("KERNEL_OK")
</pallas_src>

<mosaic_0001>
module attributes {stable_mosaic.version = 11 : i64} {
  func.func @kernel(%arg0: i32, %arg1: i32, %arg2: memref<16x128xf32, #tpu.memory_space<vmem>>, %arg3: memref<16x128xf32, #tpu.memory_space<vmem>>, %arg4: memref<1x1xf32, #tpu.memory_space<vmem>>, %arg5: memref<16x128xf32, #tpu.memory_space<vmem>>) attributes {dimension_semantics = [#tpu.dimension_semantics<parallel>, #tpu.dimension_semantics<arbitrary>], iteration_bounds = array<i64: 1, 1>, scalar_prefetch = 0 : i64, scratch_operands = 1 : i64, tpu.core_type = #tpu.core_type<tc>, window_params = [{transform_indices = @transform_0, window_bounds = array<i64: 16, 128>}, {transform_indices = @transform_1, window_bounds = array<i64: 16, 128>}, {transform_indices = @transform_2, window_bounds = array<i64: 1, 1>}]} {
    %c0_i32 = arith.constant 0 : i32
    %0 = arith.cmpi eq, %arg1, %c0_i32 : i32
    %1 = arith.extui %0 : i1 to i32
    %c0_i32_0 = arith.constant 0 : i32
    %2 = arith.cmpi ne, %1, %c0_i32_0 : i32
    scf.if %2 {
      %cst = arith.constant 0.000000e+00 : f32
      %13 = vector.broadcast %cst : f32 to vector<16x128xf32>
      %c0_10 = arith.constant 0 : index
      %c0_11 = arith.constant 0 : index
      %14 = vector.load %arg5[%c0_10, %c0_11] : memref<16x128xf32, #tpu.memory_space<vmem>>, vector<16x128xf32>
      tpu.vector_store %arg5[%c0_10, %c0_11], %13 {strides = array<i32>} : memref<16x128xf32, #tpu.memory_space<vmem>>, vector<16x128xf32>,
    } else {
    }
    %c0 = arith.constant 0 : index
    %c0_1 = arith.constant 0 : index
    %3 = vector.load %arg2[%c0, %c0_1] : memref<16x128xf32, #tpu.memory_space<vmem>>, vector<16x128xf32>
    %c0_2 = arith.constant 0 : index
    %c0_3 = arith.constant 0 : index
    %4 = vector.load %arg3[%c0_2, %c0_3] : memref<16x128xf32, #tpu.memory_space<vmem>>, vector<16x128xf32>
    %5 = arith.subf %3, %4 : vector<16x128xf32>
    %6 = arith.mulf %5, %5 : vector<16x128xf32>
    %c0_4 = arith.constant 0 : index
    %c0_5 = arith.constant 0 : index
    %7 = vector.load %arg5[%c0_4, %c0_5] : memref<16x128xf32, #tpu.memory_space<vmem>>, vector<16x128xf32>
    %8 = arith.addf %7, %6 : vector<16x128xf32>
    %c0_6 = arith.constant 0 : index
    %c0_7 = arith.constant 0 : index
    %9 = vector.load %arg5[%c0_6, %c0_7] : memref<16x128xf32, #tpu.memory_space<vmem>>, vector<16x128xf32>
    tpu.vector_store %arg5[%c0_6, %c0_7], %8 {strides = array<i32>} : memref<16x128xf32, #tpu.memory_space<vmem>>, vector<16x128xf32>,
    %c0_i32_8 = arith.constant 0 : i32
    %10 = arith.cmpi eq, %arg1, %c0_i32_8 : i32
    %11 = arith.extui %10 : i1 to i32
    %c0_i32_9 = arith.constant 0 : i32
    %12 = arith.cmpi ne, %11, %c0_i32_9 : i32
    scf.if %12 {
      %c0_10 = arith.constant 0 : index
      %c0_11 = arith.constant 0 : index
      %13 = vector.load %arg5[%c0_10, %c0_11] : memref<16x128xf32, #tpu.memory_space<vmem>>, vector<16x128xf32>
      %cst = arith.constant dense<0.000000e+00> : vector<16xf32>
      %14 = vector.multi_reduction <add>, %13, %cst [1] : vector<16x128xf32> to vector<16xf32>
      %15 = vector.shape_cast %14 : vector<16xf32> to vector<16x1xf32>
      %cst_12 = arith.constant dense<0.000000e+00> : vector<1xf32>
      %16 = vector.multi_reduction <add>, %15, %cst_12 [0] : vector<16x1xf32> to vector<1xf32>
      %17 = vector.shape_cast %16 : vector<1xf32> to vector<1x1xf32>
      %c0_13 = arith.constant 0 : index
      %c0_14 = arith.constant 0 : index
      %18 = vector.load %arg4[%c0_13, %c0_14] : memref<1x1xf32, #tpu.memory_space<vmem>>, vector<1x1xf32>
      tpu.vector_store %arg4[%c0_13, %c0_14], %17 {strides = array<i32>} : memref<1x1xf32, #tpu.memory_space<vmem>>, vector<1x1xf32>,
    } else {
    }
    return
  }
  func.func @transform_0(%arg0: i32, %arg1: i32) -> (i32, i32) {
    %c1_i32 = arith.constant 1 : i32
    %0 = arith.muli %arg0, %c1_i32 : i32
    %1 = arith.addi %0, %arg1 : i32
    %c0_i32 = arith.constant 0 : i32
    %c0_i32_0 = arith.constant 0 : i32
    return %1, %c0_i32 : i32, i32
  }
  func.func @transform_1(%arg0: i32, %arg1: i32) -> (i32, i32) {
    %c1_i32 = arith.constant 1 : i32
    %0 = arith.muli %arg0, %c1_i32 : i32
    %1 = arith.addi %0, %arg1 : i32
    %c0_i32 = arith.constant 0 : i32
    %c0_i32_0 = arith.constant 0 : i32
    return %1, %c0_i32 : i32, i32
  }
  func.func @transform_2(%arg0: i32, %arg1: i32) -> (i32, i32) {
    %c0_i32 = arith.constant 0 : i32
    %c0_i32_0 = arith.constant 0 : i32
    return %arg0, %c0_i32 : i32, i32
  }
}

</mosaic_0001>

<bundles_post_ra>
// kernel: tpu_custom_call.1
= control target key start
LH: loop header
LB: loop body
LE: loop exit
PB: predicated region body
PF: predicated region fallthrough
CT: control target
= control target key end

     0   :  { %7 = vsyncpa [#allocation4], 0  ;;  %s224_s0 = inlined_call_operand.hbm [shape: f32[16,128], index: 0, kind: input, shape index: {}]   ;;  %s225_s1 = inlined_call_operand.hbm [shape: f32[16,128], index: 1, kind: input, shape index: {}]   ;;  %s226_s2 = inlined_call_operand.hbm [shape: f32[1,1], index: 2, kind: output, shape index: {}]  }
   0x1   :  { %8 = vsyncpa [#allocation7], 0 }
   0x2   :  { %9 = vsyncpa [#allocation5], 0  ;;  %s18_s11 = sshll.u32 %s224_s0, 4  ;;  %s195_s12 = smov [#allocation3]   ;;  %s19_s11 = int_to_ptr.hbm [resolvable:$true] %s18_s11 }
   0x3   :  { %s20_s13 = sshll.u32 %s195_s12, 4  ;;  %s35_s16 = sshll.u32 %s225_s1, 4  ;;  %s21_s13 = int_to_ptr.vmem [resolvable:$true] %s20_s13  ;;  %s36_s16 = int_to_ptr.hbm [resolvable:$true] %s35_s16 }
   0x4   :  { %s196_s17 = smov 128   ;;  %s197_s18 = smov 8  }
   0x5   :  { %26 = dma.hbm_to_vmem [thread:$0]  %s19_s11, 256, %s21_s13, [#allocation4], %s196_s17, %s196_s17, %s197_s18  }
   0x6   :  { %s198_s19 = smov [#allocation6]  }
   0x7   :  { %s37_s20 = sshll.u32 %s198_s19, 4  ;;  %s38_s20 = int_to_ptr.vmem [resolvable:$true] %s37_s20 }
   0x8   :  { %43 = dma.hbm_to_vmem [thread:$0]  %s36_s16, 256, %s38_s20, [#allocation7], %s196_s17, %s196_s17, %s197_s18  }
   0x9   :  { %189 = dma.done.wait [#allocation4], 256  }
   0xa   :  { %190 = vsyncadd [#allocation4], 4294967040 }
   0xb   :  { %191 = dma.done.wait [#allocation7], 256  }
   0xc   :  { %192 = vsyncadd [#allocation7], 4294967040  ;;  %v62_v0 = vld [vmem:[#allocation3] sm:$0xff]  ;;  %v64_v1 = vld [vmem:[#allocation6] sm:$0xff]  ;;  %s199_s0 = smov [#allocation8]   ;;  %s101_s23 = sshll.u32 %s226_s2, 4  ;;  %s102_s23 = int_to_ptr.hbm [resolvable:$true] %s101_s23 }
   0xd   :  { %v66_v2 = vsub.f32 %v62_v0, %v64_v1  ;;  %v63_v3 = vld [vmem:[#allocation3 + $0x8] sm:$0xff]  ;;  %v65_v4 = vld [vmem:[#allocation6 + $0x8] sm:$0xff]  ;;  %s99_s1 = sshll.u32 %s199_s0, 4  ;;  %vm92_vm0 = vcmask 0   ;;  %s100_s1 = int_to_ptr.vmem [resolvable:$true] %s99_s1 }
   0xe   :  { %v67_v6 = vsub.f32 %v63_v3, %v65_v4 }
   0xf   :  { %v68_v5 = vmul.f32 %v66_v2, %v66_v2 }
  0x10   :  { %v69_v7 = vmul.f32 %v67_v6, %v67_v6 }
  0x11   :  { %81 = vadd.xlane.f32.xlu0 %v68_v5 }
  0x19   :  { %83 = vadd.xlane.f32.xlu0 %v69_v7 }
  0x84   :  { %v82_v8 = vpop.xlane.xlu0 %81 }
  0x8c   :  { %v84_v9 = vpop.xlane.xlu0 %83 }
  0x8d   :  { %v85_v10 = vadd.f32 %v84_v9, %v82_v8 }
  0x8f   :  { %v86_v11 = vrot.slane %v85_v10, 4 }
  0x91   :  { %v87_v12 = vadd.f32 %v86_v11, %v85_v10 }
  0x93   :  { %v88_v13 = vrot.slane %v87_v12, 2 }
  0x95   :  { %v89_v14 = vadd.f32 %v88_v13, %v87_v12 }
  0x97   :  { %v90_v15 = vrot.slane %v89_v14, 1 }
  0x99   :  { %v91_v16 = vadd.f32 %v90_v15, %v89_v14 }
  0x9b   :  { %93 = vst.msk [vmem:[#allocation8] sm:$0x1] %vm92_vm0, %v91_v16 }
  0x9c   :  { %104 = dma.vmem_to_hbm [thread:$0]  %s100_s1, 16, %s102_s23, [#allocation5]  }
  0x9d   :  { %193 = dma.done.wait [#allocation5], 16  }
  0x9e   :  { %194 = vsyncadd [#allocation5], 4294967280 }
  0x9f   :  { %109 = vsyncpa [#allocation4], 1 }
  0xa0   :  { %110 = vsyncpa [#allocation7], 1 }
  0xa1   :  { %111 = vsyncpa [#allocation5], 1 }

</bundles_post_ra>
